<compile_context>
chip_gen: v5e
topology: v5e:2x2
jax: 0.10.0
libtpu: 0.0.40
codegen_flags: <defaults>
</compile_context>

<pallas_src>
import functools

import jax
import jax.numpy as jnp
from jax import lax
from jax.experimental import pallas as pl
from jax.experimental.pallas import tpu as pltpu

_LANES = 128
_SUBLANES = 8
_MIN_TILE = _LANES * _SUBLANES  # one (8, 128) tile worth of elements


def _round_up(v, m):
    return (v + m - 1) // m * m


def _mse_partial_kernel(x_ref, t_ref, o_ref, *, rows, bm, inner, need_mask):
    """Accumulates sum((x - t)^2) for one TensorCore's slice of the rows.

    o_ref is an (8, 128) f32 block that stays resident across the inner
    (reduction) grid axis and acts as the vector accumulator.
    """
    i = pl.program_id(1)

    @pl.when(i == 0)
    def _():
        o_ref[...] = jnp.zeros_like(o_ref)

    d = x_ref[...].astype(jnp.float32) - t_ref[...].astype(jnp.float32)
    sq = d * d

    if need_mask:
        # Rows past `rows` (partial-block padding or the second core's
        # overhang block) contain garbage -> zero their contribution.
        base = (pl.program_id(0) * inner + i) * bm
        row_id = base + lax.broadcasted_iota(jnp.int32, (bm, _LANES), 0)
        sq = jnp.where(row_id < rows, sq, 0.0)

    # (bm, 128) -> (bm//8, 8, 128); reduce the leading axis with pure VPU
    # adds into the resident (8, 128) accumulator.  No per-step XLU reduce.
    o_ref[...] += jnp.sum(sq.reshape(bm // _SUBLANES, _SUBLANES, _LANES), axis=0)


def content_loss(x, target, *, block_rows=2048):
    """MSE(x, target), mean over all elements (== torch.nn.functional.mse_loss)."""
    assert x.shape == target.shape, "input/target shape mismatch"
    n = int(x.size)

    x1 = x.reshape(-1)
    t1 = target.reshape(-1)

    # Common case (n multiple of 128, at least one tile): the reshape below is
    # free relabeling, no extra HBM pass.  Otherwise do a minimal zero-pad of
    # both operands (zero diff => no effect on the sum).
    if (n % _LANES) or (n < _MIN_TILE):
        padded = max(_round_up(n, _LANES), _MIN_TILE)
        x1 = jnp.pad(x1, (0, padded - n))
        t1 = jnp.pad(t1, (0, padded - n))
    else:
        padded = n

    rows = padded // _LANES  # guaranteed >= 8
    x2 = x1.reshape(rows, _LANES)
    t2 = t1.reshape(rows, _LANES)

    # Block rows: multiple of 8, no larger than the slab.
    bm = max(_SUBLANES, (min(block_rows, rows) // _SUBLANES) * _SUBLANES)
    blocks_total = pl.cdiv(rows, bm)

    # Shard the reduction across the two TensorCores (v7x); on single-core
    # chips this is just a serial split of the same work.
    n_cores = 2 if blocks_total >= 2 else 1
    inner = pl.cdiv(blocks_total, n_cores)
    need_mask = (n_cores * inner * bm) != rows

    def in_map(p, i):
        # Clamp so a fully out-of-range block (second core's overhang)
        # re-reads the last valid block; the kernel masks it to zero.
        return (jnp.minimum(p * inner + i, blocks_total - 1), 0)

    kernel = functools.partial(
        _mse_partial_kernel, rows=rows, bm=bm, inner=inner, need_mask=need_mask
    )

    # 2 inputs x 2 pipeline buffers + headroom; clamped so it is safe on all
    # generations (v5e scoped default 16 MiB, v7x physical VMEM 64 MiB).
    tile_bytes = bm * _LANES * x2.dtype.itemsize
    vmem_limit = min(max(4 * tile_bytes + (8 << 20), 32 << 20), 56 << 20)

    partial = pl.pallas_call(
        kernel,
        out_shape=jax.ShapeDtypeStruct((n_cores * _SUBLANES, _LANES), jnp.float32),
        grid_spec=pltpu.PrefetchScalarGridSpec(
            num_scalar_prefetch=0,
            grid=(n_cores, inner),
            in_specs=[
                pl.BlockSpec((bm, _LANES), in_map),
                pl.BlockSpec((bm, _LANES), in_map),
            ],
            out_specs=pl.BlockSpec((_SUBLANES, _LANES), lambda p, i: (p, 0)),
        ),
        compiler_params=pltpu.CompilerParams(
            dimension_semantics=("parallel", "arbitrary"),
            vmem_limit_bytes=vmem_limit,
        ),
    )(x2, t2)

    # Final tiny reduction + division by the *unpadded* element count.
    return jnp.sum(partial) / n


if __name__ == "__main__":
    key = jax.random.PRNGKey(0)
    k_in, k_tgt = jax.random.split(key)

    # Small NCHW shapes consistent with the module's usage.
    shape = (2, 4, 16, 16)
    x = jax.random.normal(k_in, shape, dtype=jnp.float32)
    # "target" is a fixed (detached) tensor baked in at module construction.
    target = jax.random.normal(k_tgt, shape, dtype=jnp.float32)

    loss = content_loss(x, target)
    jax.block_until_ready(loss)

    # reference check
    ref = jnp.mean((x - target) ** 2)
    assert jnp.allclose(loss, ref, rtol=1e-6, atol=1e-6), (loss, ref)

    print("KERNEL_OK")
</pallas_src>

<mosaic_0001>
module attributes {stable_mosaic.version = 11 : i64} {
  func.func @_mse_partial_kernel(%arg0: i32, %arg1: i32, %arg2: memref<16x128xf32, #tpu.memory_space<vmem>>, %arg3: memref<16x128xf32, #tpu.memory_space<vmem>>, %arg4: memref<8x128xf32, #tpu.memory_space<vmem>>) attributes {dimension_semantics = [#tpu.dimension_semantics<parallel>, #tpu.dimension_semantics<arbitrary>], iteration_bounds = array<i64: 1, 1>, scalar_prefetch = 0 : i64, scratch_operands = 0 : i64, tpu.core_type = #tpu.core_type<tc>, window_params = [{transform_indices = @transform_0, window_bounds = array<i64: 16, 128>}, {transform_indices = @transform_1, window_bounds = array<i64: 16, 128>}, {transform_indices = @transform_2, window_bounds = array<i64: 8, 128>}]} {
    %c0_i32 = arith.constant 0 : i32
    %0 = arith.cmpi eq, %arg1, %c0_i32 : i32
    %1 = arith.extui %0 : i1 to i32
    %c0_i32_0 = arith.constant 0 : i32
    %2 = arith.cmpi ne, %1, %c0_i32_0 : i32
    scf.if %2 {
      %cst_8 = arith.constant 0.000000e+00 : f32
      %12 = vector.broadcast %cst_8 : f32 to vector<8x128xf32>
      %c0_9 = arith.constant 0 : index
      %c0_10 = arith.constant 0 : index
      %13 = vector.load %arg4[%c0_9, %c0_10] : memref<8x128xf32, #tpu.memory_space<vmem>>, vector<8x128xf32>
      tpu.vector_store %arg4[%c0_9, %c0_10], %12 {strides = array<i32>} : memref<8x128xf32, #tpu.memory_space<vmem>>, vector<8x128xf32>,
    } else {
    }
    %c0 = arith.constant 0 : index
    %c0_1 = arith.constant 0 : index
    %3 = vector.load %arg2[%c0, %c0_1] : memref<16x128xf32, #tpu.memory_space<vmem>>, vector<16x128xf32>
    %c0_2 = arith.constant 0 : index
    %c0_3 = arith.constant 0 : index
    %4 = vector.load %arg3[%c0_2, %c0_3] : memref<16x128xf32, #tpu.memory_space<vmem>>, vector<16x128xf32>
    %5 = arith.subf %3, %4 : vector<16x128xf32>
    %6 = arith.mulf %5, %5 : vector<16x128xf32>
    %c0_4 = arith.constant 0 : index
    %c0_5 = arith.constant 0 : index
    %7 = vector.load %arg4[%c0_4, %c0_5] : memref<8x128xf32, #tpu.memory_space<vmem>>, vector<8x128xf32>
    %8 = vector.shape_cast %6 : vector<16x128xf32> to vector<2x8x128xf32>
    %cst = arith.constant dense<0.000000e+00> : vector<8x128xf32>
    %9 = vector.multi_reduction <add>, %8, %cst [0] : vector<2x8x128xf32> to vector<8x128xf32>
    %10 = arith.addf %7, %9 : vector<8x128xf32>
    %c0_6 = arith.constant 0 : index
    %c0_7 = arith.constant 0 : index
    %11 = vector.load %arg4[%c0_6, %c0_7] : memref<8x128xf32, #tpu.memory_space<vmem>>, vector<8x128xf32>
    tpu.vector_store %arg4[%c0_6, %c0_7], %10 {strides = array<i32>} : memref<8x128xf32, #tpu.memory_space<vmem>>, vector<8x128xf32>,
    return
  }
  func.func @transform_0(%arg0: i32, %arg1: i32) -> (i32, i32) {
    %c1_i32 = arith.constant 1 : i32
    %0 = arith.muli %arg0, %c1_i32 : i32
    %1 = arith.addi %0, %arg1 : i32
    %c0_i32 = arith.constant 0 : i32
    %2 = arith.minsi %1, %c0_i32 : i32
    %c0_i32_0 = arith.constant 0 : i32
    %c0_i32_1 = arith.constant 0 : i32
    return %2, %c0_i32_0 : i32, i32
  }
  func.func @transform_1(%arg0: i32, %arg1: i32) -> (i32, i32) {
    %c1_i32 = arith.constant 1 : i32
    %0 = arith.muli %arg0, %c1_i32 : i32
    %1 = arith.addi %0, %arg1 : i32
    %c0_i32 = arith.constant 0 : i32
    %2 = arith.minsi %1, %c0_i32 : i32
    %c0_i32_0 = arith.constant 0 : i32
    %c0_i32_1 = arith.constant 0 : i32
    return %2, %c0_i32_0 : i32, i32
  }
  func.func @transform_2(%arg0: i32, %arg1: i32) -> (i32, i32) {
    %c0_i32 = arith.constant 0 : i32
    %c0_i32_0 = arith.constant 0 : i32
    return %arg0, %c0_i32 : i32, i32
  }
}

</mosaic_0001>

<bundles_post_ra>
// kernel: tpu_custom_call.1
= control target key start
LH: loop header
LB: loop body
LE: loop exit
PB: predicated region body
PF: predicated region fallthrough
CT: control target
= control target key end

     0   :  { %7 = vsyncpa [#allocation3], 0  ;;  %s216_s0 = inlined_call_operand.hbm [shape: f32[16,128], index: 0, kind: input, shape index: {}]   ;;  %s217_s1 = inlined_call_operand.hbm [shape: f32[16,128], index: 1, kind: input, shape index: {}]   ;;  %s218_s2 = inlined_call_operand.hbm [shape: f32[8,128], index: 2, kind: output, shape index: {}]  }
   0x1   :  { %8 = vsyncpa [#allocation6], 0 }
   0x2   :  { %9 = vsyncpa [#allocation4], 0  ;;  %s20_s11 = sshll.u32 %s216_s0, 4  ;;  %s187_s12 = smov [#allocation2]   ;;  %s21_s11 = int_to_ptr.hbm [resolvable:$true] %s20_s11 }
   0x3   :  { %s22_s13 = sshll.u32 %s187_s12, 4  ;;  %s39_s16 = sshll.u32 %s217_s1, 4  ;;  %s23_s13 = int_to_ptr.vmem [resolvable:$true] %s22_s13  ;;  %s40_s16 = int_to_ptr.hbm [resolvable:$true] %s39_s16 }
   0x4   :  { %s188_s17 = smov 128   ;;  %s189_s18 = smov 8  }
   0x5   :  { %28 = dma.hbm_to_vmem [thread:$0]  %s21_s11, 256, %s23_s13, [#allocation3], %s188_s17, %s188_s17, %s189_s18  }
   0x6   :  { %s190_s19 = smov [#allocation5]  }
   0x7   :  { %s41_s20 = sshll.u32 %s190_s19, 4  ;;  %s42_s20 = int_to_ptr.vmem [resolvable:$true] %s41_s20 }
   0x8   :  { %47 = dma.hbm_to_vmem [thread:$0]  %s40_s16, 256, %s42_s20, [#allocation6], %s188_s17, %s188_s17, %s189_s18  }
   0x9   :  { %181 = dma.done.wait [#allocation3], 256  }
   0xa   :  { %182 = vsyncadd [#allocation3], 4294967040 }
   0xb   :  { %183 = dma.done.wait [#allocation6], 256  }
   0xc   :  { %184 = vsyncadd [#allocation6], 4294967040  ;;  %v69_v0 = vld [vmem:[#allocation2] sm:$0xff]  ;;  %v70_v1 = vld [vmem:[#allocation2 + $0x8] sm:$0xff]  ;;  %s191_s0 = smov [#allocation7]   ;;  %s88_s23 = sshll.u32 %s218_s2, 4  ;;  %s89_s23 = int_to_ptr.hbm [resolvable:$true] %s88_s23 }
   0xd   :  { %v71_v2 = vld [vmem:[#allocation5] sm:$0xff]  ;;  %v72_v3 = vld [vmem:[#allocation5 + $0x8] sm:$0xff]  ;;  %s86_s1 = sshll.u32 %s191_s0, 4  ;;  %s87_s1 = int_to_ptr.vmem [resolvable:$true] %s86_s1 }
   0xe   :  { %v73_v4 = vsub.f32 %v69_v0, %v71_v2  ;;  %v74_v5 = vsub.f32 %v70_v1, %v72_v3 }
  0x10   :  { %v75_v6 = vmul.f32 %v73_v4, %v73_v4  ;;  %v76_v7 = vmul.f32 %v74_v5, %v74_v5 }
  0x12   :  { %v78_v8 = vadd.f32 %v76_v7, %v75_v6 }
  0x14   :  { %80 = vst [vmem:[#allocation7] sm:$0xff] %v78_v8 }
  0x15   :  { %91 = dma.vmem_to_hbm [thread:$0]  %s87_s1, 128, %s89_s23, [#allocation4]  }
  0x16   :  { %185 = dma.done.wait [#allocation4], 128  }
  0x17   :  { %186 = vsyncadd [#allocation4], 4294967168 }
  0x18   :  { %96 = vsyncpa [#allocation3], 1 }
  0x19   :  { %97 = vsyncpa [#allocation6], 1 }
  0x1a   :  { %98 = vsyncpa [#allocation4], 1 }

</bundles_post_ra>
